<compile_context>
chip_gen: v7x
topology: tpu7x:2x2x1
jax: 0.10.0
libtpu: 0.0.40
codegen_flags: <defaults>
</compile_context>

<pallas_src>
import jax
import jax.numpy as jnp
from jax.experimental import pallas as pl
from jax.experimental.pallas import tpu as pltpu


def _round_up(a, b):
    return (a + b - 1) // b * b


def _make_kernel(m_rows):
    """Kernel closure over the static per-block row count (batch+rows folded into M)."""
    mv = m_rows - 2  # rows whose full 3-row input window lies inside the block

    def kernel(x_ref, scale_ref, shift_ref, rowmask_ref, w_ref, b_ref, o_ref):
        # x_ref:       (M, (W+2)*C)        bf16 packed input slab
        # scale_ref:   (1, (W+2)*C)        folded-BN scale, pad lanes zeroed
        # shift_ref:   (1, (W+2)*C)        folded-BN shift, pad lanes zeroed
        # rowmask_ref: (M, 1)              1.0 on real image rows, 0.0 on pad/filler rows
        # w_ref:       (3, (W+2)*C, W*Co)  banded conv weights (bf16), resident
        # b_ref:       (1, W*Co)           conv bias tiled across W
        # o_ref:       (M, W*Co)           lane-dense f32 output block
        x = x_ref[...].astype(jnp.float32)                       # bf16 DMA, f32 VPU math
        act = jnp.maximum(x * scale_ref[...] + shift_ref[...], 0.0) * rowmask_ref[...]
        act = act.astype(jnp.bfloat16)                           # single f32->bf16 cast

        # conv3x3 as 3 banded matmuls (one per kernel row offset), bf16 operands,
        # f32 accumulation.  Output row j uses input rows j, j+1, j+2 of the block.
        acc = jnp.dot(act[0:mv, :], w_ref[0], preferred_element_type=jnp.float32)
        acc = acc + jnp.dot(act[1:mv + 1, :], w_ref[1], preferred_element_type=jnp.float32)
        acc = acc + jnp.dot(act[2:mv + 2, :], w_ref[2], preferred_element_type=jnp.float32)

        o_ref[0:mv, :] = (acc + b_ref[...]).astype(o_ref.dtype)
        # The last two rows of every block are per-image filler rows (discarded by the
        # wrapper); write zeros so the result is deterministic.
        o_ref[mv:m_rows, :] = jnp.zeros((2, o_ref.shape[1]), o_ref.dtype)

    return kernel


def basic_block(x_nchw, gamma, beta, running_mean, running_var,
                conv_w_oihw, conv_b, eps=1e-5, images_per_step=None,
                target_rows_per_step=256):
    """Forward of BasicBlock. x_nchw: (N, C, H, W) float32. Returns (N, Cout, H, W)."""
    N, C, H, W = x_nchw.shape
    Cout = conv_w_oihw.shape[0]
    S = _round_up(H + 2, 8)          # per-image row stride (pads + filler), 8-aligned
    WC = (W + 2) * C                 # packed lane width of the input slab
    WCo = W * Cout                   # packed lane width of the output (128 here)

    if images_per_step is None:
        images_per_step = max(1, min(N, target_rows_per_step // S))
    G = images_per_step
    Npad = _round_up(N, G)
    M = G * S                        # rows per grid step (matmul M = M - 2)
    steps = Npad // G

    # Fold eval-mode BatchNorm into per-channel scale/shift; zero them on the packed
    # pad lanes (column groups 0 and W+1) so relu(0*x + 0) = 0 restores conv zero-pad.
    scale = (gamma / jnp.sqrt(running_var + eps)).astype(jnp.float32)
    shift = (beta - running_mean * scale).astype(jnp.float32)
    zc = jnp.zeros((C,), jnp.float32)
    scale_t = jnp.concatenate([zc, jnp.tile(scale, W), zc]).reshape(1, WC)
    shift_t = jnp.concatenate([zc, jnp.tile(shift, W), zc]).reshape(1, WC)
    bias_t = jnp.tile(conv_b.astype(jnp.float32), W).reshape(1, WCo)

    # NCHW -> NHWC, pad batch to Npad, rows to S (1 top pad + 1 bottom pad + filler),
    # cols by 1 each side; pack into one (Npad*S, (W+2)*C) bf16 slab.  Single pad +
    # reshape: no overlapping-window duplication, no gather.
    x_nhwc = jnp.transpose(x_nchw, (0, 2, 3, 1))
    x_pad = jnp.pad(x_nhwc, ((0, Npad - N), (1, S - H - 1), (1, 1), (0, 0)))
    x_packed = x_pad.reshape(Npad * S, WC).astype(jnp.bfloat16)

    # 0/1 mask over packed rows: 1.0 on real rows (padded-row index 1..H), else 0.0.
    p = jnp.arange(Npad * S) % S
    rowmask = ((p >= 1) & (p <= H)).astype(jnp.float32).reshape(Npad * S, 1)

    # Banded ("Toeplitz") conv weights:
    #   w_banded[dh, wi*C + c, w*Cout + co] = weight[co, c, dh, wi - w]  (0 <= wi-w < 3)
    wt = jnp.transpose(conv_w_oihw, (2, 3, 1, 0)).astype(jnp.float32)   # (3, 3, C, Cout)
    wi = jnp.arange(W + 2)[:, None]
    wo = jnp.arange(W)[None, :]
    w4 = jnp.zeros((3, W + 2, C, W, Cout), jnp.float32)
    for dw in range(3):
        sel = (wi == wo + dw).astype(jnp.float32)                       # (W+2, W)
        w4 = w4 + sel[None, :, None, :, None] * wt[:, dw][:, None, :, None, :]
    w_banded = w4.reshape(3, WC, WCo).astype(jnp.bfloat16)

    # VMEM budget: double-buffered in/out blocks + resident weights + small operands.
    in_blk = M * WC * 2
    out_blk = M * WCo * 4
    need = 2 * (in_blk + out_blk + M * 4) + 3 * WC * WCo * 2 + 2 * WC * 4 + WCo * 4
    vmem_limit = int(min(64 * 2**20, max(32 * 2**20, 4 * need)))

    kernel = _make_kernel(M)

    out_packed = pl.pallas_call(
        kernel,
        out_shape=jax.ShapeDtypeStruct((Npad * S, WCo), jnp.float32),
        grid_spec=pltpu.PrefetchScalarGridSpec(
            num_scalar_prefetch=0,
            grid=(steps,),
            in_specs=[
                pl.BlockSpec((M, WC), lambda i: (i, 0)),
                pl.BlockSpec((1, WC), lambda i: (0, 0)),
                pl.BlockSpec((1, WC), lambda i: (0, 0)),
                pl.BlockSpec((M, 1), lambda i: (i, 0)),
                pl.BlockSpec((3, WC, WCo), lambda i: (0, 0, 0)),
                pl.BlockSpec((1, WCo), lambda i: (0, 0)),
            ],
            out_specs=pl.BlockSpec((M, WCo), lambda i: (i, 0)),
        ),
        compiler_params=pltpu.CompilerParams(
            dimension_semantics=("parallel",),
            vmem_limit_bytes=vmem_limit),
    )(x_packed, scale_t, shift_t, rowmask, w_banded, bias_t)

    # Per image, packed output rows [0, H) are the valid conv rows; the rest is filler.
    out_nhwc = out_packed.reshape(Npad, S, W, Cout)[:N, :H]
    return jnp.transpose(out_nhwc, (0, 3, 1, 2))


def reference_basic_block(x, gamma, beta, mean, var, w, b, eps=1e-5,
                          operand_dtype=jnp.float32):
    """Pure-JAX reference (NCHW): eval-mode BN -> ReLU -> conv3x3.

    operand_dtype=jnp.bfloat16 mimics the kernel's bf16 input DMA and bf16 MXU operands
    (with f32 accumulation).
    """
    xq = x.astype(operand_dtype).astype(jnp.float32)
    s = gamma / jnp.sqrt(var + eps)
    a = xq * s.reshape(1, -1, 1, 1) + (beta - mean * s).reshape(1, -1, 1, 1)
    a = jnp.maximum(a, 0.0)
    a = a.astype(operand_dtype).astype(jnp.float32)
    wq = w.astype(operand_dtype).astype(jnp.float32)
    out = jax.lax.conv_general_dilated(
        a, wq, window_strides=(1, 1), padding=((1, 1), (1, 1)),
        dimension_numbers=("NCHW", "OIHW", "NCHW"),
        precision=jax.lax.Precision.HIGHEST)
    return out + b.reshape(1, -1, 1, 1)


if __name__ == "__main__":
    N, Cin, Cout, H, W = 2, 4, 8, 16, 16

    key = jax.random.PRNGKey(0)
    k_x, k_g, k_b, k_m, k_v, k_w, k_cb = jax.random.split(key, 7)

    x = jax.random.normal(k_x, (N, Cin, H, W), dtype=jnp.float32)

    gamma = 1.0 + 0.1 * jax.random.normal(k_g, (Cin,), dtype=jnp.float32)
    beta = 0.1 * jax.random.normal(k_b, (Cin,), dtype=jnp.float32)
    running_mean = 0.1 * jax.random.normal(k_m, (Cin,), dtype=jnp.float32)
    running_var = jnp.abs(jax.random.normal(k_v, (Cin,), dtype=jnp.float32)) + 0.5
    conv_w = 0.1 * jax.random.normal(k_w, (Cout, Cin, 3, 3), dtype=jnp.float32)
    conv_b = 0.05 * jax.random.normal(k_cb, (Cout,), dtype=jnp.float32)

    out = basic_block(x, gamma, beta, running_mean, running_var, conv_w, conv_b)
    out = jax.block_until_ready(out)
    assert out.shape == (N, Cout, H, W), out.shape

    # Tight check vs. a reference with bf16-rounded input + activation operands
    # (matches the kernel's bf16 DMA + bf16 MXU operands + f32 accumulation).
    ref_bf16 = reference_basic_block(x, gamma, beta, running_mean, running_var,
                                     conv_w, conv_b, operand_dtype=jnp.bfloat16)
    assert jnp.allclose(out, ref_bf16, atol=2e-3, rtol=2e-3), \
        float(jnp.max(jnp.abs(out - ref_bf16)))

    # Loose check vs. the full-f32 reference (bf16 operands introduce ~1e-2 abs error).
    ref_f32 = reference_basic_block(x, gamma, beta, running_mean, running_var,
                                    conv_w, conv_b)
    assert jnp.allclose(out, ref_f32, atol=5e-2, rtol=5e-2), \
        float(jnp.max(jnp.abs(out - ref_f32)))

    print("KERNEL_OK")
</pallas_src>

<mosaic_0001>
module attributes {stable_mosaic.version = 11 : i64} {
  func.func @kernel(%arg0: i32, %arg1: memref<48x72xbf16, #tpu.memory_space<vmem>>, %arg2: memref<1x72xf32, #tpu.memory_space<vmem>>, %arg3: memref<1x72xf32, #tpu.memory_space<vmem>>, %arg4: memref<48x1xf32, #tpu.memory_space<vmem>>, %arg5: memref<3x72x128xbf16, #tpu.memory_space<vmem>>, %arg6: memref<1x128xf32, #tpu.memory_space<vmem>>, %arg7: memref<48x128xf32, #tpu.memory_space<vmem>>) attributes {dimension_semantics = [#tpu.dimension_semantics<parallel>], iteration_bounds = array<i64: 1>, scalar_prefetch = 0 : i64, scratch_operands = 0 : i64, tpu.core_type = #tpu.core_type<tc>, window_params = [{transform_indices = @transform_0, window_bounds = array<i64: 48, 72>}, {pipeline_mode = #tpu.pipeline_mode<synchronous>, transform_indices = @transform_1, window_bounds = array<i64: 1, 72>}, {pipeline_mode = #tpu.pipeline_mode<synchronous>, transform_indices = @transform_2, window_bounds = array<i64: 1, 72>}, {transform_indices = @transform_3, window_bounds = array<i64: 48, 1>}, {pipeline_mode = #tpu.pipeline_mode<synchronous>, transform_indices = @transform_4, window_bounds = array<i64: 3, 72, 128>}, {pipeline_mode = #tpu.pipeline_mode<synchronous>, transform_indices = @transform_5, window_bounds = array<i64: 1, 128>}, {transform_indices = @transform_6, window_bounds = array<i64: 48, 128>}]} {
    %c0 = arith.constant 0 : index
    %c0_0 = arith.constant 0 : index
    %0 = vector.load %arg1[%c0, %c0_0] : memref<48x72xbf16, #tpu.memory_space<vmem>>, vector<48x72xbf16>
    %1 = arith.extf %0 : vector<48x72xbf16> to vector<48x72xf32>
    %c0_1 = arith.constant 0 : index
    %c0_2 = arith.constant 0 : index
    %2 = vector.load %arg2[%c0_1, %c0_2] : memref<1x72xf32, #tpu.memory_space<vmem>>, vector<1x72xf32>
    %3 = vector.broadcast %2 : vector<1x72xf32> to vector<48x72xf32>
    %4 = arith.mulf %1, %3 : vector<48x72xf32>
    %c0_3 = arith.constant 0 : index
    %c0_4 = arith.constant 0 : index
    %5 = vector.load %arg3[%c0_3, %c0_4] : memref<1x72xf32, #tpu.memory_space<vmem>>, vector<1x72xf32>
    %6 = vector.broadcast %5 : vector<1x72xf32> to vector<48x72xf32>
    %7 = arith.addf %4, %6 : vector<48x72xf32>
    %cst = arith.constant 0.000000e+00 : f32
    %8 = vector.broadcast %cst : f32 to vector<48x72xf32>
    %9 = arith.maximumf %7, %8 : vector<48x72xf32>
    %c0_5 = arith.constant 0 : index
    %c0_6 = arith.constant 0 : index
    %10 = vector.load %arg4[%c0_5, %c0_6] : memref<48x1xf32, #tpu.memory_space<vmem>>, vector<48x1xf32>
    %11 = vector.broadcast %10 : vector<48x1xf32> to vector<48x72xf32>
    %12 = arith.mulf %9, %11 : vector<48x72xf32>
    %13 = arith.truncf %12 : vector<48x72xf32> to vector<48x72xbf16>
    %14 = vector.extract_strided_slice %13 {offsets = [0, 0], sizes = [46, 72], strides = [1, 1]} : vector<48x72xbf16> to vector<46x72xbf16>
    %c0_7 = arith.constant 0 : index
    %c0_8 = arith.constant 0 : index
    %c0_9 = arith.constant 0 : index
    %15 = vector.load %arg5[%c0_7, %c0_8, %c0_9] : memref<3x72x128xbf16, #tpu.memory_space<vmem>>, vector<1x72x128xbf16>
    %16 = vector.shape_cast %15 : vector<1x72x128xbf16> to vector<72x128xbf16>
    %cst_10 = arith.constant dense<0.000000e+00> : vector<46x128xf32>
    %17 = tpu.matmul %14, %16, %cst_10 {dimension_numbers = #tpu.dot_dimension_numbers<[1], [0], [0], [1], [0, 0, 1, 1], [], []>} : vector<46x72xbf16>, vector<72x128xbf16>, vector<46x128xf32> -> vector<46x128xf32>
    %18 = vector.extract_strided_slice %13 {offsets = [1, 0], sizes = [46, 72], strides = [1, 1]} : vector<48x72xbf16> to vector<46x72xbf16>
    %c1 = arith.constant 1 : index
    %c0_11 = arith.constant 0 : index
    %c0_12 = arith.constant 0 : index
    %19 = vector.load %arg5[%c1, %c0_11, %c0_12] : memref<3x72x128xbf16, #tpu.memory_space<vmem>>, vector<1x72x128xbf16>
    %20 = vector.shape_cast %19 : vector<1x72x128xbf16> to vector<72x128xbf16>
    %cst_13 = arith.constant dense<0.000000e+00> : vector<46x128xf32>
    %21 = tpu.matmul %18, %20, %cst_13 {dimension_numbers = #tpu.dot_dimension_numbers<[1], [0], [0], [1], [0, 0, 1, 1], [], []>} : vector<46x72xbf16>, vector<72x128xbf16>, vector<46x128xf32> -> vector<46x128xf32>
    %22 = arith.addf %17, %21 : vector<46x128xf32>
    %23 = vector.extract_strided_slice %13 {offsets = [2, 0], sizes = [46, 72], strides = [1, 1]} : vector<48x72xbf16> to vector<46x72xbf16>
    %c2 = arith.constant 2 : index
    %c0_14 = arith.constant 0 : index
    %c0_15 = arith.constant 0 : index
    %24 = vector.load %arg5[%c2, %c0_14, %c0_15] : memref<3x72x128xbf16, #tpu.memory_space<vmem>>, vector<1x72x128xbf16>
    %25 = vector.shape_cast %24 : vector<1x72x128xbf16> to vector<72x128xbf16>
    %cst_16 = arith.constant dense<0.000000e+00> : vector<46x128xf32>
    %26 = tpu.matmul %23, %25, %cst_16 {dimension_numbers = #tpu.dot_dimension_numbers<[1], [0], [0], [1], [0, 0, 1, 1], [], []>} : vector<46x72xbf16>, vector<72x128xbf16>, vector<46x128xf32> -> vector<46x128xf32>
    %27 = arith.addf %22, %26 : vector<46x128xf32>
    %c0_17 = arith.constant 0 : index
    %c0_18 = arith.constant 0 : index
    %28 = vector.load %arg6[%c0_17, %c0_18] : memref<1x128xf32, #tpu.memory_space<vmem>>, vector<1x128xf32>
    %29 = vector.broadcast %28 : vector<1x128xf32> to vector<46x128xf32>
    %30 = arith.addf %27, %29 : vector<46x128xf32>
    %c0_19 = arith.constant 0 : index
    %c0_20 = arith.constant 0 : index
    %31 = vector.load %arg7[%c0_19, %c0_20] : memref<48x128xf32, #tpu.memory_space<vmem>>, vector<46x128xf32>
    tpu.vector_store %arg7[%c0_19, %c0_20], %30 {strides = array<i32>} : memref<48x128xf32, #tpu.memory_space<vmem>>, vector<46x128xf32>,
    %cst_21 = arith.constant 0.000000e+00 : f32
    %32 = vector.broadcast %cst_21 : f32 to vector<2x128xf32>
    %c46 = arith.constant 46 : index
    %c0_22 = arith.constant 0 : index
    %33 = vector.load %arg7[%c46, %c0_22] : memref<48x128xf32, #tpu.memory_space<vmem>>, vector<2x128xf32>
    tpu.vector_store %arg7[%c46, %c0_22], %32 {strides = array<i32>} : memref<48x128xf32, #tpu.memory_space<vmem>>, vector<2x128xf32>,
    return
  }
  func.func @transform_0(%arg0: i32) -> (i32, i32) {
    %c0_i32 = arith.constant 0 : i32
    %c0_i32_0 = arith.constant 0 : i32
    return %arg0, %c0_i32 : i32, i32
  }
  func.func @transform_1(%arg0: i32) -> (i32, i32) {
    %c0_i32 = arith.constant 0 : i32
    %c0_i32_0 = arith.constant 0 : i32
    %c0_i32_1 = arith.constant 0 : i32
    return %c0_i32, %c0_i32_0 : i32, i32
  }
  func.func @transform_2(%arg0: i32) -> (i32, i32) {
    %c0_i32 = arith.constant 0 : i32
    %c0_i32_0 = arith.constant 0 : i32
    %c0_i32_1 = arith.constant 0 : i32
    return %c0_i32, %c0_i32_0 : i32, i32
  }
  func.func @transform_3(%arg0: i32) -> (i32, i32) {
    %c0_i32 = arith.constant 0 : i32
    %c0_i32_0 = arith.constant 0 : i32
    return %arg0, %c0_i32 : i32, i32
  }
  func.func @transform_4(%arg0: i32) -> (i32, i32, i32) {
    %c0_i32 = arith.constant 0 : i32
    %c0_i32_0 = arith.constant 0 : i32
    %c0_i32_1 = arith.constant 0 : i32
    %c0_i32_2 = arith.constant 0 : i32
    return %c0_i32, %c0_i32_0, %c0_i32_1 : i32, i32, i32
  }
  func.func @transform_5(%arg0: i32) -> (i32, i32) {
    %c0_i32 = arith.constant 0 : i32
    %c0_i32_0 = arith.constant 0 : i32
    %c0_i32_1 = arith.constant 0 : i32
    return %c0_i32, %c0_i32_0 : i32, i32
  }
  func.func @transform_6(%arg0: i32) -> (i32, i32) {
    %c0_i32 = arith.constant 0 : i32
    %c0_i32_0 = arith.constant 0 : i32
    return %arg0, %c0_i32 : i32, i32
  }
}

</mosaic_0001>

<bundles_post_ra>
// kernel: tpu_custom_call.1
= control target key start
LH: loop header
LB: loop body
LE: loop exit
PB: predicated region body
PF: predicated region fallthrough
CT: control target
= control target key end

     0   :  { %11 = vsyncpa [#allocation3], 0  ;;  %s904_s0 = inlined_call_operand.vmem [shape: bf16[48,72], index: 0, kind: input, shape index: {}]   ;;  %s905_s1 = inlined_call_operand.vmem [shape: f32[1,72], index: 1, kind: input, shape index: {}]   ;;  %s906_s2 = inlined_call_operand.vmem [shape: f32[1,72], index: 2, kind: input, shape index: {}]   ;;  %s907_s3 = inlined_call_operand.vmem [shape: f32[48,1], index: 3, kind: input, shape index: {}]   ;;  %s908_s4 = inlined_call_operand.hbm [shape: bf16[3,72,128], index: 4, kind: input, shape index: {}]   ;;  %s909_s5 = inlined_call_operand.vmem [shape: f32[1,128], index: 5, kind: input, shape index: {}]   ;;  %s910_s6 = inlined_call_operand.hbm [shape: f32[48,128], index: 6, kind: output, shape index: {}]  }
   0x1   :  { %12 = vsyncpa [#allocation4], 0  ;;  %s735_s21 = smov [#allocation2]   ;;  %s687_s25 = scalar_lea.hbm %s908_s4, 1728 }
   0x2   :  { %s26_s22 = sshll.u32 %s735_s21, 4  ;;  %p688_p0 = scmp.ne.s32.totalorder %s908_s4, %s687_s25  ;;  %s27_s22 = int_to_ptr.vmem [resolvable:$true] %s26_s22 }
   0x3   :  { %p691_p1 = scmp.lt.u32.totalorder %s687_s25, %s908_s4 }
   0x5   :  { %p693_p2 = pnand %p691_p1, %p688_p0 }
   0x7   :  { %696 = shalt.err (!%p693_p2)
}
   0x8   :  { %s697_s30 = scalar_lea.vmem %s27_s22, 1728  ;;  %p702_p4 = scmp.lt.s32.totalorder %s27_s22, %s27_s22 }
   0x9   :  { %p698_p3 = scmp.ne.s32.totalorder %s27_s22, %s697_s30  ;;  %p703_p5 = scmp.lt.s32.totalorder %s697_s30, %s697_s30 }
   0xb   :  { %p704_p6 = por %p703_p5, %p702_p4 }
   0xd   :  { %p705_p7 = pnand %p704_p6, %p698_p3 }
   0xf   :  { %708 = shalt.err (!%p705_p7)
}
  0x10   :  { %s736_s7 = smov 64   ;;  %s737_s8 = smov 4  }
  0x11   :  { %32 = dma.hbm_to_vmem [thread:$0]  %s908_s4, 1728, %s27_s22, [#allocation3], %s736_s7, %s736_s7, %s737_s8  }
  0x12   :  { %731 = dma.done.wait [#allocation3], 1728  }
  0x13   :  { %732 = vsyncadd [#allocation3], 4294965568  ;;  %v738_v0 = vmov 0   ;;  %v739_v1 = vmov 0.0   ;;  %v85_v2 = vld [vmem:[%s907_s3 + $0x10] sm:$0xff]  ;;  %v83_v3 = vld [vmem:[%s907_s3] sm:$0xff] }
  0x14   :  { %671 = vset.pattern.permute.xlu1 %v738_v0  ;;  %670 = vset.pattern.permute.xlu0 %v738_v0  ;;  %502 = vst [vmem:[#allocation5 + $0x2e] sm:$0x3] %v739_v1  ;;  %v86_v4 = vld [vmem:[%s907_s3 + $0x18] sm:$0xff]  ;;  %v84_v5 = vld [vmem:[%s907_s3 + $0x8] sm:$0xff]  ;;  %v672_v6 = vld [vmem:[#allocation2] sm:$0xff]   ;;  %vm740_vm0 = vmmov 0  }
  0x15   :  { %607 = vmatprep.subr.bf16.mxu1 %v739_v1  ;;  %585 = vmatprep.subr.bf16.mxu0 %v739_v1  ;;  %v673_v7 = vld [vmem:[#allocation2 + $0x8] sm:$0xff]   ;;  %v87_v10 = vld [vmem:[%s907_s3 + $0x20] sm:$0xff]  ;;  %v675_v11 = vld [vmem:[#allocation2 + $0x10] sm:$0xff]   ;;  %vm208_vm1 = vcmask 1043456   ;;  %vm198_vm2 = vcmask 588800   ;;  %vm375_vm4 = vcmask 1046528  }
  0x16   :  { %101 = vperm.xlu1 %671, %v85_v2   ;;  %91 = vperm.xlu0 %670, %v83_v3   ;;  %v674_v8 = vld [vmem:[#allocation2 + $0x24] sm:$0xff]   ;;  %v676_v12 = vld [vmem:[#allocation2 + $0x2c] sm:$0xff]   ;;  %v678_v13 = vld [vmem:[#allocation2 + $0x34] sm:$0xff]   ;;  %vm147_vm3 = vsmask.f32 7424 }
  0x17   :  { %608 = vmatpush3.bf16.msra.mxu1 %v672_v6  ;;  %v88_v9 = vld [vmem:[%s907_s3 + $0x28] sm:$0xff]  ;;  %586 = vmatpush3.bf16.msra.mxu0 %v674_v8  ;;  %v677_v14 = vld [vmem:[#allocation2 + $0x18] sm:$0xff]   ;;  %v679_v15 = vld [vmem:[#allocation2 + $0x20] ss:$0 sps:$4 sm:$0xff]  }
  0x18   :  { %609 = vmatprep.subr.bf16.mxu1 %v739_v1  ;;  %587 = vmatprep.subr.bf16.mxu0 %v739_v1  ;;  %v680_v16 = vld [vmem:[#allocation2 + $0x3c] sm:$0xff]   ;;  %v682_v17 = vld [vmem:[#allocation2 + $0x44] ss:$0 sps:$4 sm:$0xff]   ;;  %v303_v18 = vsel %vm208_vm1, %v679_v15, 0  ;;  %v559_v20 = vld [vmem:[%s904_s0 + $0x8] sm:$0xff]  }
  0x19   :  { %617 = vmatprep.mubr.msk.bf16.mxu1 %vm740_vm0, %v739_v1  ;;  %595 = vmatprep.mubr.msk.bf16.mxu0 %vm740_vm0, %v739_v1  ;;  %v210_v19 = vsel %vm208_vm1, %v682_v17, 0  ;;  %v548_v21 = vld [vmem:[%s904_s0] sm:$0xff]   ;;  %v553_v22 = vunpack.c.l.bf16 %v559_v20  ;;  %v554_v24 = vunpack.c.h.bf16 %v559_v20  ;;  %v560_v26 = vld [vmem:[%s904_s0 + $0x10] sm:$0xff]   ;;  %v681_v57 = vld [vmem:[#allocation2 + $0x48] sm:$0xff]  }
  0x1a   :  { %106 = vperm.xlu1 %671, %v86_v4   ;;  %96 = vperm.xlu0 %670, %v84_v5   ;;  %v549_v23 = vunpack.c.l.bf16 %v548_v21  ;;  %v550_v25 = vunpack.c.h.bf16 %v548_v21  ;;  %v520_v27 = vld [vmem:[%s905_s1] ss:$0 sm:$0xff]  ;;  %v558_v29 = vunpack.c.h.bf16 %v560_v26  ;;  %v557_v33 = vunpack.c.l.bf16 %v560_v26  ;;  %v683_v0 = vld [vmem:[#allocation2 + $0x50] sm:$0xff]  }
  0x1b   :  { %610 = vmatpush3.bf16.msra.mxu1 %v673_v7  ;;  %588 = vmatpush3.bf16.msra.mxu0 %v676_v12  ;;  %v60_v28 = vmul.f32 %v553_v22, %v520_v27  ;;  %v61_v31 = vmul.f32 %v554_v24, %v520_v27  ;;  %v521_v34 = vld [vmem:[%s906_s2] ss:$0 sm:$0xff]  ;;  %s741_s2 = smov [#allocation5]  }
  0x1c   :  { %611 = vmatprep.subr.bf16.mxu1 %v739_v1  ;;  %589 = vmatprep.subr.bf16.mxu0 %v739_v1  ;;  %v58_v30 = vmul.f32 %v549_v23, %v520_v27  ;;  %v59_v32 = vmul.f32 %v550_v25, %v520_v27  ;;  %v63_v36 = vmul.f32 %v558_v29, %v520_v27  ;;  %v685_v12 = vld [vmem:[#allocation2 + $0x60] sm:$0xff]  }
  0x1d   :  { %v73_v35 = vadd.f32 %v521_v34, %v60_v28  ;;  %v74_v38 = vadd.f32 %v521_v34, %v61_v31  ;;  %v62_v40 = vmul.f32 %v557_v33, %v520_v27 }
  0x1e   :  { %116 = vperm.xlu1 %671, %v88_v9   ;;  %111 = vperm.xlu0 %670, %v87_v10   ;;  %v71_v37 = vadd.f32 %v521_v34, %v58_v30  ;;  %v72_v39 = vadd.f32 %v521_v34, %v59_v32  ;;  %v76_v44 = vadd.f32 %v521_v34, %v63_v36  ;;  %v684_v9 = vld [vmem:[#allocation2 + $0x58] sm:$0xff]  }
  0x1f   :  { %612 = vmatpush3.bf16.msra.mxu1 %v675_v11  ;;  %590 = vmatpush3.bf16.msra.mxu0 %v678_v13  ;;  %v79_v41 = vmax.f32 %v73_v35, 0.0  ;;  %v80_v46 = vmax.f32 %v74_v38, 0.0  ;;  %v75_v48 = vadd.f32 %v521_v34, %v62_v40  ;;  %v686_v13 = vld [vmem:[#allocation2 + $0x68] ss:$0 sps:$4 sm:$0xff]  }
  0x20   :  { %613 = vmatprep.subr.bf16.mxu1 %v739_v1  ;;  %591 = vmatprep.subr.bf16.mxu0 %v739_v1  ;;  %v77_v45 = vmax.f32 %v71_v37, 0.0  ;;  %v78_v47 = vmax.f32 %v72_v39, 0.0  ;;  %v82_v52 = vmax.f32 %v76_v44, 0.0  ;;  %v418_v17 = vsel %vm208_vm1, %v686_v13, 0 }
  0x21   :  { %v81_v56 = vmax.f32 %v75_v48, 0.0 }
  0x23   :  { %614 = vmatpush3.bf16.msra.mxu1 %v677_v14  ;;  %592 = vmatpush3.bf16.msra.mxu0 %v680_v16 }
  0x24   :  { %615 = vmatprep.subr.bf16.mxu1 %v739_v1  ;;  %593 = vmatprep.subr.bf16.mxu0 %v739_v1 }
  0x27   :  { %616 = vmatpush3.bf16.msra.mxu1 %v303_v18  ;;  %594 = vmatpush3.bf16.msra.mxu0 %v210_v19 }
  0x28   :  { %651 = vmatprep.subr.bf16.mxu1 %v739_v1  ;;  %629 = vmatprep.subr.bf16.mxu0 %v739_v1 }
  0x95   :  { %v102_v42 = vpop.permute.xlu1 %101  ;;  %v92_v43 = vpop.permute.xlu0 %91 }
  0x96   :  { %v121_v49 = vmul.f32 %v102_v42, %v79_v41  ;;  %v119_v53 = vmul.f32 %v92_v43, %v77_v45 }
  0x99   :  { %v107_v50 = vpop.permute.xlu1 %106  ;;  %v97_v51 = vpop.permute.xlu0 %96 }
  0x9a   :  { %v122_v54 = vmul.f32 %v107_v50, %v80_v46  ;;  %v120_v55 = vmul.f32 %v97_v51, %v78_v47  ;;  %v546_v51 = vld [vmem:[%s909_s5] ss:$0 sm:$0xff]  ;;  %s508_s5 = sshll.u32 %s741_s2, 4  ;;  %s509_s5 = int_to_ptr.vmem [resolvable:$true] %s508_s5 }
  0x9b   :  { %s709_s7 = scalar_lea.vmem %s509_s5, 768  ;;  %p714_p9 = scmp.lt.s32.totalorder %s509_s5, %s509_s5 }
  0x9c   :  { %v843_v58 = vpack.c.bf16 %v122_v54, %v121_v49  ;;  %v845_v59 = vpack.c.bf16 %v120_v55, %v119_v53  ;;  %p710_p8 = scmp.ne.s32.totalorder %s509_s5, %s709_s7  ;;  %p715_p10 = scmp.lt.s32.totalorder %s709_s7, %s709_s7 }
  0x9d   :  { %v117_v60 = vpop.permute.xlu1 %116  ;;  %v112_v61 = vpop.permute.xlu0 %111 }
  0x9e   :  { %v124_v62 = vmul.f32 %v117_v60, %v82_v52  ;;  %v123_v63 = vmul.f32 %v112_v61, %v81_v56  ;;  %618 = vmatmul.mubr.msk.bf16.vlgmr.msra.gmra.mrb[0].mxu1 %vm198_vm2, %v845_v59  ;;  %v151_v2 = vshll.u32 %v845_v59, 16  ;;  %v156_v3 = vshll.u32 %v843_v58, 16  ;;  %p716_p11 = por %p715_p10, %p714_p9 }
  0x9f   :  { %656 = vmatpush3.bf16.msra.mxu1 %v681_v57  ;;  %621 = vmatprep.mubr.msk.bf16.mxu1 %vm740_vm0, %v739_v1  ;;  %v149_v5 = vshrl.u32 %v845_v59, 16  ;;  %v160_v14 = vshrl.u32 %v843_v58, 16  ;;  %v377_v21 = vrot.slane %v843_v58, 1  ;;  %v376_v24 = vrot.slane %v845_v59, 1 }
  0xa0   :  { %652 = vmatprep.subr.bf16.mxu1 %v739_v1  ;;  %v127_v4 = vpack.c.bf16 %v124_v62, %v123_v63  ;;  %v153_v6 = vrot.slane %v151_v2, 1  ;;  %v158_v8 = vrot.slane %v156_v3, 1  ;;  %p717_p12 = pnand %p716_p11, %p710_p8 }
  0xa1   :  { %v378_v25 = vsel %vm375_vm4, %v376_v24, %v377_v21 }
  0xa2   :  { %v154_v7 = vor.u32 %v153_v6, %v149_v5  ;;  %v164_v11 = vshll.u32 %v127_v4, 16  ;;  %v162_v16 = vor.u32 %v160_v14, %v158_v8  ;;  %v379_v19 = vrot.slane %v127_v4, 1 }
  0xa3   :  { %657 = vmatpush3.bf16.msra.mxu1 %v683_v0  ;;  %v168_v20 = vshrl.u32 %v127_v4, 16 }
  0xa4   :  { %653 = vmatprep.subr.bf16.mxu1 %v739_v1  ;;  %v159_v10 = vsel %vm147_vm3, %v154_v7, %v158_v8  ;;  %v166_v15 = vrot.slane %v164_v11, 1  ;;  %v380_v23 = vsel %vm375_vm4, %v377_v21, %v379_v19 }
  0xa5   :  { %596 = vmatmul.mubr.msk.bf16.vlgmr.msra.gmra.mrb[0].mxu0 %vm198_vm2, %v159_v10 }
  0xa6   :  { %622 = vmatmul.mubr.msk.bf16.gmra.mrb[4].mxu1 %vm198_vm2, %v843_v58  ;;  %630 = vmatpush3.bf16.msra.mxu0 %v681_v57  ;;  %v167_v18 = vsel %vm147_vm3, %v162_v16, %v166_v15  ;;  %v170_v22 = vor.u32 %v168_v20, %v166_v15 }
  0xa7   :  { %658 = vmatpush3.bf16.msra.mxu1 %v684_v9  ;;  %631 = vmatprep.subr.bf16.mxu0 %v739_v1 }
  0xa8   :  { %599 = vmatprep.mubr.msk.bf16.mxu0 %vm740_vm0, %v739_v1  ;;  %654 = vmatprep.subr.bf16.mxu1 %v739_v1 }
  0xa9   :  { %625 = vmatprep.mubr.msk.bf16.mxu1 %vm740_vm0, %v739_v1 }
  0xaa   :  { %632 = vmatpush3.bf16.msra.mxu0 %v683_v0 }
  0xab   :  { %659 = vmatpush3.bf16.msra.mxu1 %v685_v12  ;;  %633 = vmatprep.subr.bf16.mxu0 %v739_v1 }
  0xac   :  { %655 = vmatprep.subr.bf16.mxu1 %v739_v1 }
  0xad   :  { %600 = vmatmul.mubr.msk.bf16.gmra.mrb[4].mxu0 %vm198_vm2, %v167_v18 }
  0xae   :  { %626 = vmatmul.mubr.msk.bf16.gmra.mrb[8].mxu1 %vm198_vm2, %v127_v4  ;;  %634 = vmatpush3.bf16.msra.mxu0 %v684_v9 }
  0xaf   :  { %660 = vmatpush3.bf16.msra.mxu1 %v418_v17  ;;  %603 = vmatprep.mubr.msk.bf16.mxu0 %vm740_vm0, %v739_v1 }
  0xb0   :  { %635 = vmatprep.subr.bf16.mxu0 %v739_v1  ;;  %643 = vmatprep.mubr.msk.bf16.mxu1 %vm740_vm0, %v739_v1 }
  0xb2   :  { %636 = vmatpush3.bf16.msra.mxu0 %v685_v12 }
  0xb3   :  { %637 = vmatprep.subr.bf16.mxu0 %v739_v1 }
  0xb5   :  { %604 = vmatmul.mubr.msk.bf16.gmra.mrb[8].mxu0 %vm198_vm2, %v170_v22 }
  0xb6   :  { %644 = vmatmul.mubr.msk.bf16.vlgmr.msra.gmra.mrb[12].mxu1 %vm198_vm2, %v380_v23  ;;  %638 = vmatpush3.bf16.msra.mxu0 %v418_v17 }
  0xb7   :  { %639 = vmatprep.mubr.msk.bf16.mxu0 %vm740_vm0, %v739_v1  ;;  %647 = vmatprep.mubr.msk.bf16.mxu1 %vm740_vm0, %v739_v1 }
  0xbd   :  { %640 = vmatmul.mubr.msk.bf16.vlgmr.msra.gmra.mrb[12].mxu0 %vm198_vm2, %v378_v25 }
  0xbe   :  { %648 = vmatmul.mubr.msk.bf16.gmra.mrb[16].mxu1 %vm198_vm2, %v379_v19 }
 0x171   :  { %v339_v26 = vpop.f32.mrb[0].mxu1 }
 0x172   :  { %v619_v27 = vpop.f32.mrb[1].mxu1 }
 0x173   :  { %v342_v28 = vpop.f32.mrb[2].mxu1 }
 0x174   :  { %v620_v29 = vpop.f32.mrb[3].mxu1 }
 0x178   :  { %v246_v30 = vpop.f32.mrb[0].mxu0 }
 0x179   :  { %v347_v31 = vpop.f32.mrb[4].mxu1  ;;  %v340_v32 = vadd.f32 %v339_v26, %v246_v30  ;;  %v597_v33 = vpop.f32.mrb[1].mxu0 }
 0x17a   :  { %v623_v34 = vpop.f32.mrb[5].mxu1  ;;  %v249_v35 = vpop.f32.mrb[2].mxu0 }
 0x17b   :  { %v350_v36 = vpop.f32.mrb[6].mxu1  ;;  %v343_v37 = vadd.f32 %v342_v28, %v249_v35  ;;  %v598_v1 = vpop.f32.mrb[3].mxu0 }
 0x17c   :  { %v624_v38 = vpop.f32.mrb[7].mxu1 }
 0x180   :  { %v254_v39 = vpop.f32.mrb[4].mxu0 }
 0x181   :  { %v355_v40 = vpop.f32.mrb[8].mxu1  ;;  %v348_v41 = vadd.f32 %v347_v31, %v254_v39  ;;  %v601_v42 = vpop.f32.mrb[5].mxu0 }
 0x182   :  { %v627_v43 = vpop.f32.mrb[9].mxu1  ;;  %v257_v44 = vpop.f32.mrb[6].mxu0 }
 0x183   :  { %v358_v45 = vpop.f32.mrb[10].mxu1  ;;  %v351_v46 = vadd.f32 %v350_v36, %v257_v44  ;;  %v602_v47 = vpop.f32.mrb[7].mxu0 }
 0x184   :  { %v628_v48 = vpop.f32.mrb[11].mxu1 }
 0x188   :  { %v262_v49 = vpop.f32.mrb[8].mxu0 }
 0x189   :  { %v462_v50 = vpop.f32.mrb[12].mxu1  ;;  %v356_v52 = vadd.f32 %v355_v40, %v262_v49  ;;  %v605_v53 = vpop.f32.mrb[9].mxu0 }
 0x18a   :  { %v479_v54 = vadd.f32 %v462_v50, %v348_v41  ;;  %v645_v55 = vpop.f32.mrb[13].mxu1  ;;  %v265_v56 = vpop.f32.mrb[10].mxu0 }
 0x18b   :  { %v465_v57 = vpop.f32.mrb[14].mxu1  ;;  %v359_v59 = vadd.f32 %v358_v45, %v265_v56  ;;  %v606_v60 = vpop.f32.mrb[11].mxu0 }
 0x18c   :  { %v492_v58 = vadd.f32 %v546_v51, %v479_v54  ;;  %v480_v61 = vadd.f32 %v465_v57, %v351_v46  ;;  %v646_v62 = vpop.f32.mrb[15].mxu1 }
 0x18e   :  { %498 = vst [vmem:[#allocation5 + $0x10] sm:$0xff] %v492_v58  ;;  %v493_v63 = vadd.f32 %v546_v51, %v480_v61 }
 0x190   :  { %499 = vst [vmem:[#allocation5 + $0x18] sm:$0xff] %v493_v63  ;;  %v454_v0 = vpop.f32.mrb[12].mxu0 }
 0x191   :  { %v470_v2 = vpop.f32.mrb[16].mxu1  ;;  %v477_v3 = vadd.f32 %v454_v0, %v340_v32  ;;  %v641_v4 = vpop.f32.mrb[13].mxu0 }
 0x192   :  { %v481_v5 = vadd.f32 %v470_v2, %v356_v52  ;;  %v649_v6 = vpop.f32.mrb[17].mxu1  ;;  %v457_v7 = vpop.f32.mrb[14].mxu0 }
 0x193   :  { %v473_v8 = vpop.f32.mrb[18].mxu1  ;;  %v490_v9 = vadd.f32 %v546_v51, %v477_v3  ;;  %v478_v11 = vadd.f32 %v457_v7, %v343_v37  ;;  %v642_v12 = vpop.f32.mrb[15].mxu0 }
 0x194   :  { %v494_v10 = vadd.f32 %v546_v51, %v481_v5  ;;  %v482_v13 = vadd.f32 %v473_v8, %v359_v59  ;;  %v650_v14 = vpop.f32.mrb[19].mxu1 }
 0x195   :  { %496 = vst [vmem:[#allocation5] sm:$0xff] %v490_v9  ;;  %v491_v15 = vadd.f32 %v546_v51, %v478_v11 }
 0x196   :  { %500 = vst [vmem:[#allocation5 + $0x20] sm:$0xff] %v494_v10  ;;  %v495_v16 = vadd.f32 %v546_v51, %v482_v13 }
 0x197   :  { %497 = vst [vmem:[#allocation5 + $0x8] sm:$0xff] %v491_v15 }
 0x198   :  { %501 = vst [vmem:[#allocation5 + $0x28] sm:$0x3f] %v495_v16 }
 0x199   :  { %720 = shalt.err (!%p717_p12)
}
 0x19a   :  { %s721_s10 = scalar_lea.hbm %s910_s6, 768 }
 0x19b   :  { %p722_p13 = scmp.ne.s32.totalorder %s910_s6, %s721_s10  ;;  %p725_p0 = scmp.lt.u32.totalorder %s721_s10, %s910_s6 }
 0x19d   :  { %p727_p1 = pnand %p725_p0, %p722_p13 }
 0x19f   :  { %730 = shalt.err (!%p727_p1)
}
 0x1a0   :  { %s742_s4 = smov 128   ;;  %s743_s15 = smov 8  }
 0x1a1   :  { %514 = dma.vmem_to_hbm [thread:$0]  %s509_s5, 768, %s910_s6, [#allocation4], %s742_s4, %s742_s4, %s743_s15  }
 0x1a2   :  { %733 = dma.done.wait [#allocation4], 768  }
 0x1a3   :  { %734 = vsyncadd [#allocation4], 4294966528 }
 0x1a4   :  { %518 = vsyncpa [#allocation3], 1 }
 0x1a5   :  { %519 = vsyncpa [#allocation4], 1 }

</bundles_post_ra>
